<compile_context>
chip_gen: v7x
topology: tpu7x:2x2x1
jax: 0.10.0
libtpu: 0.0.40
codegen_flags: <defaults>
</compile_context>

<pallas_src>
import functools

import jax
import jax.numpy as jnp
from jax.experimental import pallas as pl
from jax.experimental.pallas import tpu as pltpu

_LANE = 128      # TPU lane width (last dim of a vreg)
_SUBLANE = 8     # TPU sublane count (second-to-last dim of a vreg, f32)
_K_PAD = 8       # layer-1 contraction width after folding b1 + zero padding


def _round_up(v, m):
    return ((v + m - 1) // m) * m


def _default_num_tiles():
    """One grid step per TensorCore: v5e/v6e have 1 TC, v7x has 2."""
    try:
        kind = jax.devices()[0].device_kind.lower()
    except Exception:
        return 1
    return 2 if ("v7" in kind or "7x" in kind) else 1


def _mlp_kernel(x_ref, w1_ref, w2_ref, b2_ref, w3_ref, b3_ref, o_ref):
    """Fused 3-layer MLP forward for one batch tile.

    Layer-1 bias is folded into w1 (x carries a ones column), so layer 1 is a
    single K=8 MXU pass.  Hidden dim is lane-padded to 128 (done once in the
    pre-padded params).  The output keeps its true (tiny) width so the HBM
    writeback stays minimal.
    """
    x = x_ref[...]                                              # (block_n, 8)
    h1 = jnp.maximum(
        jnp.dot(x, w1_ref[...], preferred_element_type=jnp.float32), 0.0)
    h2 = jnp.maximum(
        jnp.dot(h1, w2_ref[...], preferred_element_type=jnp.float32)
        + b2_ref[...], 0.0)
    out = (jnp.dot(h2, w3_ref[...], preferred_element_type=jnp.float32)
           + b3_ref[...])
    o_ref[...] = out.astype(o_ref.dtype)


def prepare_padded_params(w1, b1, w2, b2, w3, b3):
    """Pad params once (call outside the per-step path and reuse the result).

    Returns:
      w1_aug: (8, H_pad)      rows [0:d_in] = w1, row d_in = b1, rest zero
      w2_p:   (H_pad, H_pad)  zero-padded hidden dims (mathematically inert)
      b2_p:   (1, H_pad)
      w3_p:   (H_pad, d_out)  output dim kept at its true width
      b3_p:   (1, d_out)
    """
    d_in, d_hidden = w1.shape
    d_out = w3.shape[1]
    h_pad = _round_up(d_hidden, _LANE)
    assert d_in + 1 <= _K_PAD, "layer-1 fan_in + bias must fit in 8 lanes"

    w1_aug = jnp.zeros((_K_PAD, h_pad), jnp.float32)
    w1_aug = w1_aug.at[:d_in, :d_hidden].set(w1.astype(jnp.float32))
    w1_aug = w1_aug.at[d_in, :d_hidden].set(b1.reshape(-1).astype(jnp.float32))

    w2_p = jnp.zeros((h_pad, h_pad), jnp.float32)
    w2_p = w2_p.at[:d_hidden, :d_hidden].set(w2.astype(jnp.float32))
    b2_p = jnp.zeros((1, h_pad), jnp.float32)
    b2_p = b2_p.at[:, :d_hidden].set(b2.reshape(1, -1).astype(jnp.float32))

    w3_p = jnp.zeros((h_pad, d_out), jnp.float32)
    w3_p = w3_p.at[:d_hidden, :].set(w3.astype(jnp.float32))
    b3_p = b3.reshape(1, d_out).astype(jnp.float32)
    return w1_aug, w2_p, b2_p, w3_p, b3_p


@functools.partial(jax.jit, static_argnames=("num_tiles",))
def net_forward(x, w1_aug, w2_p, b2_p, w3_p, b3_p, *, num_tiles=1):
    """x: [N, D_in]; remaining args come from `prepare_padded_params`."""
    n, d_in = x.shape
    k_pad, h_pad = w1_aug.shape
    d_out = w3_p.shape[1]

    # Batch: num_tiles tiles, each a multiple of 8 rows; pad rows with zeros
    # and slice the result back (handles N=500 or any batch size).
    block_n = _round_up(pl.cdiv(n, num_tiles), _SUBLANE)
    n_padded = block_n * num_tiles

    # Append the ones column that folds b1 into w1, then zero-pad rows/cols.
    ones = jnp.ones((n, 1), x.dtype)
    x_aug = jnp.concatenate([x, ones], axis=1)                   # (n, d_in+1)
    x_aug = jnp.pad(x_aug, ((0, n_padded - n), (0, k_pad - (d_in + 1))))

    flops = 2 * n_padded * (k_pad * h_pad + h_pad * h_pad + h_pad * d_out)
    bytes_accessed = 4 * (x_aug.size + w1_aug.size + w2_p.size + b2_p.size
                          + w3_p.size + b3_p.size + n_padded * d_out)

    in_specs = [
        pl.BlockSpec((block_n, k_pad), lambda i: (i, 0)),   # x tile (per step)
        pl.BlockSpec((k_pad, h_pad), lambda i: (0, 0)),     # w1 (+b1), resident
        pl.BlockSpec((h_pad, h_pad), lambda i: (0, 0)),     # w2
        pl.BlockSpec((1, h_pad), lambda i: (0, 0)),         # b2
        pl.BlockSpec((h_pad, d_out), lambda i: (0, 0)),     # w3 (true width)
        pl.BlockSpec((1, d_out), lambda i: (0, 0)),         # b3
    ]
    out_specs = pl.BlockSpec((block_n, d_out), lambda i: (i, 0))

    out_padded = pl.pallas_call(
        _mlp_kernel,
        out_shape=jax.ShapeDtypeStruct((n_padded, d_out), jnp.float32),
        grid_spec=pltpu.PrefetchScalarGridSpec(
            num_scalar_prefetch=0,
            grid=(num_tiles,),
            in_specs=in_specs,
            out_specs=out_specs,
        ),
        compiler_params=pltpu.CompilerParams(
            dimension_semantics=("parallel",),   # shards tiles across TCs (v7x)
        ),
        cost_estimate=pl.CostEstimate(
            flops=flops, transcendentals=0, bytes_accessed=bytes_accessed),
    )(x_aug, w1_aug, w2_p, b2_p, w3_p, b3_p)

    # Only the row slice remains; output width is already the true d_out.
    return out_padded[:n] if n_padded != n else out_padded


def init_params(key, n_input, n_hidden, n_output):
    """PyTorch-style Linear init: U(-1/sqrt(fan_in), 1/sqrt(fan_in))."""
    def linear(k, fan_in, fan_out):
        kw, kb = jax.random.split(k)
        bound = 1.0 / jnp.sqrt(fan_in)
        w = jax.random.uniform(kw, (fan_in, fan_out), jnp.float32, -bound, bound)
        b = jax.random.uniform(kb, (1, fan_out), jnp.float32, -bound, bound)
        return w, b

    k1, k2, k3 = jax.random.split(key, 3)
    w1, b1 = linear(k1, n_input, n_hidden)
    w2, b2 = linear(k2, n_hidden, n_hidden)
    w3, b3 = linear(k3, n_hidden, n_output)
    return w1, b1, w2, b2, w3, b3


def net_forward_ref(x, w1, b1, w2, b2, w3, b3):
    """Pure-JAX reference for correctness checking."""
    h1 = jnp.maximum(x @ w1 + b1, 0.0)
    h2 = jnp.maximum(h1 @ w2 + b2, 0.0)
    return h2 @ w3 + b3


if __name__ == "__main__":
    D_IN = 2
    D_HIDDEN = 32
    D_OUT = 2

    key = jax.random.PRNGKey(0)
    kx1, kx2, kp = jax.random.split(key, 3)
    raw_params = init_params(kp, D_IN, D_HIDDEN, D_OUT)
    padded_params = prepare_padded_params(*raw_params)   # once, outside the hot path
    num_tiles = _default_num_tiles()

    # Small check with a batch NOT divisible by 8 (exercises the row-pad path).
    x_small = jax.random.uniform(kx1, (20, D_IN), jnp.float32, -6.0, 6.0)
    out_small = jax.block_until_ready(
        net_forward(x_small, *padded_params, num_tiles=1))
    ref_small = net_forward_ref(x_small, *raw_params)
    assert out_small.shape == (20, D_OUT)
    assert jnp.allclose(out_small, ref_small, atol=1e-4, rtol=1e-5), "small mismatch"

    # The module's actual workload: N=500, x ~ U(-6, 6).
    x_full = jax.random.uniform(kx2, (500, D_IN), jnp.float32, -6.0, 6.0)
    out_full = jax.block_until_ready(
        net_forward(x_full, *padded_params, num_tiles=num_tiles))
    ref_full = net_forward_ref(x_full, *raw_params)
    assert out_full.shape == (500, D_OUT)
    assert jnp.allclose(out_full, ref_full, atol=1e-4, rtol=1e-5), "N=500 mismatch"

    print("KERNEL_OK")
</pallas_src>

<mosaic_0001>
module attributes {stable_mosaic.version = 11 : i64} {
  func.func @_mlp_kernel(%arg0: i32, %arg1: memref<24x8xf32, #tpu.memory_space<vmem>>, %arg2: memref<8x128xf32, #tpu.memory_space<vmem>>, %arg3: memref<128x128xf32, #tpu.memory_space<vmem>>, %arg4: memref<1x128xf32, #tpu.memory_space<vmem>>, %arg5: memref<128x2xf32, #tpu.memory_space<vmem>>, %arg6: memref<1x2xf32, #tpu.memory_space<vmem>>, %arg7: memref<24x2xf32, #tpu.memory_space<vmem>>) attributes {dimension_semantics = [#tpu.dimension_semantics<parallel>], iteration_bounds = array<i64: 1>, scalar_prefetch = 0 : i64, scratch_operands = 0 : i64, tpu.core_type = #tpu.core_type<tc>, window_params = [{transform_indices = @transform_0, window_bounds = array<i64: 24, 8>}, {pipeline_mode = #tpu.pipeline_mode<synchronous>, transform_indices = @transform_1, window_bounds = array<i64: 8, 128>}, {pipeline_mode = #tpu.pipeline_mode<synchronous>, transform_indices = @transform_2, window_bounds = array<i64: 128, 128>}, {pipeline_mode = #tpu.pipeline_mode<synchronous>, transform_indices = @transform_3, window_bounds = array<i64: 1, 128>}, {pipeline_mode = #tpu.pipeline_mode<synchronous>, transform_indices = @transform_4, window_bounds = array<i64: 128, 2>}, {pipeline_mode = #tpu.pipeline_mode<synchronous>, transform_indices = @transform_5, window_bounds = array<i64: 1, 2>}, {transform_indices = @transform_6, window_bounds = array<i64: 24, 2>}]} {
    %c0 = arith.constant 0 : index
    %c0_0 = arith.constant 0 : index
    %0 = vector.load %arg1[%c0, %c0_0] : memref<24x8xf32, #tpu.memory_space<vmem>>, vector<24x8xf32>
    %c0_1 = arith.constant 0 : index
    %c0_2 = arith.constant 0 : index
    %1 = vector.load %arg2[%c0_1, %c0_2] : memref<8x128xf32, #tpu.memory_space<vmem>>, vector<8x128xf32>
    %cst = arith.constant dense<0.000000e+00> : vector<24x128xf32>
    %2 = tpu.matmul %0, %1, %cst {dimension_numbers = #tpu.dot_dimension_numbers<[1], [0], [0], [1], [0, 0, 1, 1], [], []>} : vector<24x8xf32>, vector<8x128xf32>, vector<24x128xf32> -> vector<24x128xf32>
    %cst_3 = arith.constant 0.000000e+00 : f32
    %3 = vector.broadcast %cst_3 : f32 to vector<24x128xf32>
    %4 = arith.maximumf %2, %3 : vector<24x128xf32>
    %c0_4 = arith.constant 0 : index
    %c0_5 = arith.constant 0 : index
    %5 = vector.load %arg3[%c0_4, %c0_5] : memref<128x128xf32, #tpu.memory_space<vmem>>, vector<128x128xf32>
    %cst_6 = arith.constant dense<0.000000e+00> : vector<24x128xf32>
    %6 = tpu.matmul %4, %5, %cst_6 {dimension_numbers = #tpu.dot_dimension_numbers<[1], [0], [0], [1], [0, 0, 1, 1], [], []>} : vector<24x128xf32>, vector<128x128xf32>, vector<24x128xf32> -> vector<24x128xf32>
    %c0_7 = arith.constant 0 : index
    %c0_8 = arith.constant 0 : index
    %7 = vector.load %arg4[%c0_7, %c0_8] : memref<1x128xf32, #tpu.memory_space<vmem>>, vector<1x128xf32>
    %8 = vector.broadcast %7 : vector<1x128xf32> to vector<24x128xf32>
    %9 = arith.addf %6, %8 : vector<24x128xf32>
    %cst_9 = arith.constant 0.000000e+00 : f32
    %10 = vector.broadcast %cst_9 : f32 to vector<24x128xf32>
    %11 = arith.maximumf %9, %10 : vector<24x128xf32>
    %c0_10 = arith.constant 0 : index
    %c0_11 = arith.constant 0 : index
    %12 = vector.load %arg5[%c0_10, %c0_11] : memref<128x2xf32, #tpu.memory_space<vmem>>, vector<128x2xf32>
    %cst_12 = arith.constant dense<0.000000e+00> : vector<24x2xf32>
    %13 = tpu.matmul %11, %12, %cst_12 {dimension_numbers = #tpu.dot_dimension_numbers<[1], [0], [0], [1], [0, 0, 1, 1], [], []>} : vector<24x128xf32>, vector<128x2xf32>, vector<24x2xf32> -> vector<24x2xf32>
    %c0_13 = arith.constant 0 : index
    %c0_14 = arith.constant 0 : index
    %14 = vector.load %arg6[%c0_13, %c0_14] : memref<1x2xf32, #tpu.memory_space<vmem>>, vector<1x2xf32>
    %15 = vector.broadcast %14 : vector<1x2xf32> to vector<24x2xf32>
    %16 = arith.addf %13, %15 : vector<24x2xf32>
    %c0_15 = arith.constant 0 : index
    %c0_16 = arith.constant 0 : index
    %17 = vector.load %arg7[%c0_15, %c0_16] : memref<24x2xf32, #tpu.memory_space<vmem>>, vector<24x2xf32>
    tpu.vector_store %arg7[%c0_15, %c0_16], %16 {strides = array<i32>} : memref<24x2xf32, #tpu.memory_space<vmem>>, vector<24x2xf32>,
    return
  }
  func.func @transform_0(%arg0: i32) -> (i32, i32) {
    %c0_i32 = arith.constant 0 : i32
    %c0_i32_0 = arith.constant 0 : i32
    return %arg0, %c0_i32 : i32, i32
  }
  func.func @transform_1(%arg0: i32) -> (i32, i32) {
    %c0_i32 = arith.constant 0 : i32
    %c0_i32_0 = arith.constant 0 : i32
    %c0_i32_1 = arith.constant 0 : i32
    return %c0_i32, %c0_i32_0 : i32, i32
  }
  func.func @transform_2(%arg0: i32) -> (i32, i32) {
    %c0_i32 = arith.constant 0 : i32
    %c0_i32_0 = arith.constant 0 : i32
    %c0_i32_1 = arith.constant 0 : i32
    return %c0_i32, %c0_i32_0 : i32, i32
  }
  func.func @transform_3(%arg0: i32) -> (i32, i32) {
    %c0_i32 = arith.constant 0 : i32
    %c0_i32_0 = arith.constant 0 : i32
    %c0_i32_1 = arith.constant 0 : i32
    return %c0_i32, %c0_i32_0 : i32, i32
  }
  func.func @transform_4(%arg0: i32) -> (i32, i32) {
    %c0_i32 = arith.constant 0 : i32
    %c0_i32_0 = arith.constant 0 : i32
    %c0_i32_1 = arith.constant 0 : i32
    return %c0_i32, %c0_i32_0 : i32, i32
  }
  func.func @transform_5(%arg0: i32) -> (i32, i32) {
    %c0_i32 = arith.constant 0 : i32
    %c0_i32_0 = arith.constant 0 : i32
    %c0_i32_1 = arith.constant 0 : i32
    return %c0_i32, %c0_i32_0 : i32, i32
  }
  func.func @transform_6(%arg0: i32) -> (i32, i32) {
    %c0_i32 = arith.constant 0 : i32
    %c0_i32_0 = arith.constant 0 : i32
    return %arg0, %c0_i32 : i32, i32
  }
}

</mosaic_0001>

<bundles_post_ra>
// kernel: net_forward.1
= control target key start
LH: loop header
LB: loop body
LE: loop exit
PB: predicated region body
PF: predicated region fallthrough
CT: control target
= control target key end

     0   :  { %vm27_vm0 = vcmask 64512   ;;  %v528_v0 = vmov 0.0   ;;  %vm529_vm1 = vmmov 0   ;;  %v530_v3 = vmov 0.0|0.0   ;;  %s727_s1 = inlined_call_operand.vmem [shape: f32[8,128], index: 1, kind: input, shape index: {}]   ;;  %s728_s0 = inlined_call_operand.vmem [shape: f32[24,8], index: 0, kind: input, shape index: {}]   ;;  %s729_s2 = inlined_call_operand.vmem [shape: f32[128,128], index: 2, kind: input, shape index: {}]   ;;  %s730_s4 = inlined_call_operand.vmem [shape: f32[128,2], index: 4, kind: input, shape index: {}]   ;;  %s731_s3 = inlined_call_operand.vmem [shape: f32[1,128], index: 3, kind: input, shape index: {}]   ;;  %s732_s5 = inlined_call_operand.vmem [shape: f32[1,2], index: 5, kind: input, shape index: {}]   ;;  %s733_s6 = inlined_call_operand.vmem [shape: f32[24,2], index: 6, kind: output, shape index: {}]  }
   0x1   :  { %384 = vmatprep.subr.mxu0 %v528_v0  ;;  %v26_v1 = vld [vmem:[%s727_s1] sm:$0xff]  ;;  %386 = vmatprep.mubr.msk.f32.mxu0 %vm529_vm1, %v528_v0  ;;  %v121_v5 = vld [vmem:[%s729_s2 + $0x8] sm:$0xff]  ;;  %v122_v7 = vld [vmem:[%s729_s2 + $0x10] sm:$0xff]  ;;  %vm329_vm2 = vcmask 15360  }
   0x2   :  { %v23_v2 = vld [vmem:[%s728_s0] sm:$0xff]  ;;  %385 = vmatpush3.msra.mxu0 %v26_v1  ;;  %477 = vmatprep.subr.bf16.mxu1 %v530_v3  ;;  %v123_v8 = vld [vmem:[%s729_s2 + $0x18] sm:$0xff]  ;;  %v24_v9 = vld [vmem:[%s728_s0 + $0x8] sm:$0xff] }
   0x3   :  { %v120_v4 = vld [vmem:[%s729_s2] sm:$0xff]  ;;  %387 = vmatmul.mubr.msk.f32.vlgmr.msra.gmra.mrb[0].mxu0 %vm27_vm0, %v23_v2  ;;  %427 = vmatprep.mubr.msk.f32.mxu1 %vm529_vm1, %v528_v0  ;;  %v481_v10 = vpack.c.bf16 %v123_v8, %v122_v7  ;;  %v125_v12 = vld [vmem:[%s729_s2 + $0x28] sm:$0xff]  ;;  %v25_v13 = vld [vmem:[%s728_s0 + $0x10] sm:$0xff] }
   0x4   :  { %v478_v6 = vpack.c.bf16 %v121_v5, %v120_v4  ;;  %389 = vmatprep.mubr.msk.f32.mxu0 %vm529_vm1, %v528_v0  ;;  %501 = vmatprep.subr.bf16.mxu0 %v530_v3  ;;  %v124_v11 = vld [vmem:[%s729_s2 + $0x20] sm:$0xff]  ;;  %v126_v15 = vld [vmem:[%s729_s2 + $0x30] sm:$0xff]  ;;  %v127_v16 = vld [vmem:[%s729_s2 + $0x38] sm:$0xff] }
   0x5   :  { %v484_v14 = vpack.c.bf16 %v125_v12, %v124_v11  ;;  %v487_v17 = vpack.c.bf16 %v127_v16, %v126_v15  ;;  %v128_v18 = vld [vmem:[%s729_s2 + $0x40] sm:$0xff]  ;;  %v129_v19 = vld [vmem:[%s729_s2 + $0x48] sm:$0xff]  ;;  %v130_v21 = vld [vmem:[%s729_s2 + $0x50] sm:$0xff] }
   0x6   :  { %479 = vmatpush3.bf16.msra.mxu1 %v478_v6  ;;  %v490_v20 = vpack.c.bf16 %v129_v19, %v128_v18  ;;  %v131_v22 = vld [vmem:[%s729_s2 + $0x58] sm:$0xff]  ;;  %v132_v24 = vld [vmem:[%s729_s2 + $0x60] sm:$0xff]  ;;  %v133_v25 = vld [vmem:[%s729_s2 + $0x68] sm:$0xff] }
   0x7   :  { %480 = vmatprep.subr.bf16.mxu1 %v530_v3  ;;  %390 = vmatmul.mubr.msk.f32.gmra.mrb[2].mxu0 %vm27_vm0, %v24_v9  ;;  %v493_v23 = vpack.c.bf16 %v131_v22, %v130_v21  ;;  %v496_v26 = vpack.c.bf16 %v133_v25, %v132_v24  ;;  %v134_v27 = vld [vmem:[%s729_s2 + $0x70] sm:$0xff]  ;;  %v135_v28 = vld [vmem:[%s729_s2 + $0x78] sm:$0xff]  ;;  %v226_v30 = vld [vmem:[%s730_s4] sm:$0xff] }
   0x8   :  { %392 = vmatprep.mubr.msk.f32.mxu0 %vm529_vm1, %v528_v0  ;;  %v499_v29 = vpack.c.bf16 %v135_v28, %v134_v27  ;;  %v227_v31 = vld [vmem:[%s730_s4 + $0x8] sm:$0xff]  ;;  %v228_v32 = vld [vmem:[%s730_s4 + $0x10] sm:$0xff]  ;;  %v229_v34 = vld [vmem:[%s730_s4 + $0x18] sm:$0xff] }
   0x9   :  { %v502_v33 = vpack.c.bf16 %v227_v31, %v226_v30  ;;  %v505_v35 = vpack.c.bf16 %v229_v34, %v228_v32  ;;  %v230_v36 = vld [vmem:[%s730_s4 + $0x20] sm:$0xff]  ;;  %v231_v37 = vld [vmem:[%s730_s4 + $0x28] sm:$0xff]  ;;  %v232_v39 = vld [vmem:[%s730_s4 + $0x30] sm:$0xff] }
   0xa   :  { %482 = vmatpush3.bf16.msra.mxu1 %v481_v10  ;;  %v508_v38 = vpack.c.bf16 %v231_v37, %v230_v36  ;;  %v233_v40 = vld [vmem:[%s730_s4 + $0x38] sm:$0xff]  ;;  %v234_v42 = vld [vmem:[%s730_s4 + $0x40] sm:$0xff]  ;;  %v235_v43 = vld [vmem:[%s730_s4 + $0x48] sm:$0xff] }
   0xb   :  { %483 = vmatprep.subr.bf16.mxu1 %v530_v3  ;;  %393 = vmatmul.mubr.msk.f32.gmra.mrb[4].mxu0 %vm27_vm0, %v25_v13  ;;  %v511_v41 = vpack.c.bf16 %v233_v40, %v232_v39  ;;  %v514_v44 = vpack.c.bf16 %v235_v43, %v234_v42  ;;  %v236_v45 = vld [vmem:[%s730_s4 + $0x50] sm:$0xff]  ;;  %v237_v46 = vld [vmem:[%s730_s4 + $0x58] sm:$0xff]  ;;  %v238_v48 = vld [vmem:[%s730_s4 + $0x60] sm:$0xff] }
   0xc   :  { %468 = vmatprep.mubr.msk.f32.mxu0 %vm529_vm1, %v528_v0  ;;  %503 = vmatpush3.bf16.msra.mxu0 %v502_v33  ;;  %v517_v47 = vpack.c.bf16 %v237_v46, %v236_v45  ;;  %v239_v49 = vld [vmem:[%s730_s4 + $0x68] sm:$0xff]  ;;  %v240_v60 = vld [vmem:[%s730_s4 + $0x70] sm:$0xff]  ;;  %v241_v61 = vld [vmem:[%s730_s4 + $0x78] sm:$0xff] }
   0xd   :  { %504 = vmatprep.subr.bf16.mxu0 %v530_v3  ;;  %v520_v50 = vpack.c.bf16 %v239_v49, %v238_v48  ;;  %v523_v62 = vpack.c.bf16 %v241_v61, %v240_v60  ;;  %v340_v63 = vld [vmem:[%s731_s3] ss:$0 sm:$0xff] }
   0xe   :  { %485 = vmatpush3.bf16.msra.mxu1 %v484_v14  ;;  %v341_v13 = vld [vmem:[%s732_s5] ss:$0 sm:$0xff] }
   0xf   :  { %486 = vmatprep.subr.bf16.mxu1 %v530_v3 }
  0x10   :  { %506 = vmatpush3.bf16.msra.mxu0 %v505_v35 }
  0x11   :  { %507 = vmatprep.subr.bf16.mxu0 %v530_v3 }
  0x12   :  { %488 = vmatpush3.bf16.msra.mxu1 %v487_v17 }
  0x13   :  { %489 = vmatprep.subr.bf16.mxu1 %v530_v3 }
  0x14   :  { %509 = vmatpush3.bf16.msra.mxu0 %v508_v38 }
  0x15   :  { %510 = vmatprep.subr.bf16.mxu0 %v530_v3 }
  0x16   :  { %491 = vmatpush3.bf16.msra.mxu1 %v490_v20 }
  0x17   :  { %492 = vmatprep.subr.bf16.mxu1 %v530_v3 }
  0x18   :  { %512 = vmatpush3.bf16.msra.mxu0 %v511_v41 }
  0x19   :  { %513 = vmatprep.subr.bf16.mxu0 %v530_v3 }
  0x1a   :  { %494 = vmatpush3.bf16.msra.mxu1 %v493_v23 }
  0x1b   :  { %495 = vmatprep.subr.bf16.mxu1 %v530_v3 }
  0x1c   :  { %515 = vmatpush3.bf16.msra.mxu0 %v514_v44 }
  0x1d   :  { %516 = vmatprep.subr.bf16.mxu0 %v530_v3 }
  0x1e   :  { %497 = vmatpush3.bf16.msra.mxu1 %v496_v26 }
  0x1f   :  { %498 = vmatprep.subr.bf16.mxu1 %v530_v3 }
  0x20   :  { %518 = vmatpush3.bf16.msra.mxu0 %v517_v47 }
  0x21   :  { %519 = vmatprep.subr.bf16.mxu0 %v530_v3 }
  0x22   :  { %500 = vmatpush3.bf16.msra.mxu1 %v499_v29 }
  0x24   :  { %521 = vmatpush3.bf16.msra.mxu0 %v520_v50 }
  0x25   :  { %522 = vmatprep.subr.bf16.mxu0 %v530_v3 }
  0x28   :  { %524 = vmatpush3.bf16.msra.mxu0 %v523_v62 }
  0xd6   :  { %v103_v51 = vpop.f32.mrb[0].mxu0 }
  0xd7   :  { %v117_v52 = vmax.f32 %v103_v51, 0.0  ;;  %v388_v53 = vpop.f32.mrb[1].mxu0 }
  0xd9   :  { %428 = vmatmul.mubr.f32.vlgmr.msra.gmra.mrb[0].mxu1 %v117_v52 }
  0xda   :  { %v108_v54 = vpop.f32.mrb[2].mxu0  ;;  %430 = vmatprep.mubr.msk.f32.mxu1 %vm529_vm1, %v528_v0 }
  0xdb   :  { %v118_v55 = vmax.f32 %v108_v54, 0.0  ;;  %v391_v56 = vpop.f32.mrb[3].mxu0 }
  0xdd   :  { %431 = vmatmul.mubr.f32.gmra.mrb[2].mxu1 %v118_v55 }
  0xde   :  { %v113_v57 = vpop.f32.mrb[4].mxu0  ;;  %433 = vmatprep.mubr.msk.f32.mxu1 %vm529_vm1, %v528_v0 }
  0xdf   :  { %v119_v58 = vmax.f32 %v113_v57, 0.0  ;;  %v394_v59 = vpop.f32.mrb[5].mxu0 }
  0xe1   :  { %434 = vmatmul.mubr.f32.gmra.mrb[4].mxu1 %v119_v58 }
 0x1ac   :  { %v209_v1 = vpop.f32.mrb[0].mxu1 }
 0x1ad   :  { %v210_v2 = vadd.f32 %v340_v63, %v209_v1  ;;  %v429_v3 = vpop.f32.mrb[1].mxu1 }
 0x1af   :  { %v223_v4 = vmax.f32 %v210_v2, 0.0 }
 0x1b0   :  { %v214_v5 = vpop.f32.mrb[2].mxu1 }
 0x1b1   :  { %v215_v6 = vadd.f32 %v340_v63, %v214_v5  ;;  %v432_v7 = vpop.f32.mrb[3].mxu1  ;;  %469 = vmatmul.mubr.f32.vlgmr.msra.gmra.mrb[6].mxu0 %v223_v4 }
 0x1b2   :  { %471 = vmatprep.mubr.msk.f32.mxu0 %vm529_vm1, %v528_v0 }
 0x1b3   :  { %v224_v8 = vmax.f32 %v215_v6, 0.0 }
 0x1b4   :  { %v219_v9 = vpop.f32.mrb[4].mxu1 }
 0x1b5   :  { %v220_v10 = vadd.f32 %v340_v63, %v219_v9  ;;  %v435_v11 = vpop.f32.mrb[5].mxu1  ;;  %472 = vmatmul.mubr.f32.gmra.mrb[8].mxu0 %v224_v8 }
 0x1b6   :  { %474 = vmatprep.mubr.msk.f32.mxu0 %vm529_vm1, %v528_v0 }
 0x1b7   :  { %v225_v12 = vmax.f32 %v220_v10, 0.0 }
 0x1b9   :  { %475 = vmatmul.mubr.f32.gmra.mrb[10].mxu0 %v225_v12 }
 0x284   :  { %v315_v14 = vpop.f32.mrb[6].mxu0 }
 0x285   :  { %v316_v15 = vadd.f32 %v341_v13, %v315_v14  ;;  %v470_v16 = vpop.f32.mrb[7].mxu0 }
 0x287   :  { %330 = vst.msk [vmem:[%s733_s6] sm:$0xff] %vm329_vm2, %v316_v15 }
 0x288   :  { %v320_v17 = vpop.f32.mrb[8].mxu0 }
 0x289   :  { %v321_v18 = vadd.f32 %v341_v13, %v320_v17  ;;  %v473_v19 = vpop.f32.mrb[9].mxu0 }
 0x28b   :  { %331 = vst.msk [vmem:[%s733_s6 + $0x8] sm:$0xff] %vm329_vm2, %v321_v18 }
 0x28c   :  { %v325_v0 = vpop.f32.mrb[10].mxu0 }
 0x28d   :  { %v326_v20 = vadd.f32 %v341_v13, %v325_v0  ;;  %v476_v21 = vpop.f32.mrb[11].mxu0 }
 0x28f   :  { %332 = vst.msk [vmem:[%s733_s6 + $0x10] sm:$0xff] %vm329_vm2, %v326_v20 }

</bundles_post_ra>
